<compile_context>
chip_gen: v5e
topology: v5e:2x2
jax: 0.10.0
libtpu: 0.0.40
codegen_flags: <defaults>
</compile_context>

<pallas_src>
import functools

import jax
import jax.numpy as jnp
from jax.experimental import pallas as pl
from jax.experimental.pallas import tpu as pltpu


def _round8(x):
    return (x + 7) & ~7


class _Layout:
    """Static row layout of a packed [rows, width] f32 slab."""

    def __init__(self):
        self.pieces = {}        # name -> (row0, (rows, cols))
        self.rows = 0
        self.width = 0

    def add(self, name, shape):
        r0 = self.rows
        self.pieces[name] = (r0, (int(shape[0]), int(shape[1])))
        self.rows = r0 + _round8(int(shape[0]))
        self.width = max(self.width, int(shape[1]))
        return r0


def block_diag(mats):
    total = sum(m.shape[0] for m in mats)
    out = jnp.zeros((total, total), jnp.float32)
    off = 0
    for m in mats:
        k = m.shape[0]
        out = out.at[off:off + k, off:off + k].set(m)
        off += k
    return out


# ----------------------------- fused kernel ---------------------------------

def _generator_kernel(slab_ref, out_ref, *, in_layout, out_layout, n,
                      num_gnn_layers, num_mlp_layers):
    f32 = jnp.float32
    bf16 = jnp.bfloat16
    n3 = 3 * n

    def rd(name):
        r0, (h, wd) = in_layout.pieces[name]
        return slab_ref[r0:r0 + h, :wd]

    def wr(name, val):
        r0, (h, wd) = out_layout.pieces[name]
        out_ref[r0:r0 + h, :wd] = val

    out_ref[...] = jnp.zeros_like(out_ref)

    # --- perturbation adjacency (f32, exact): one [3N,3N] matmul -------------
    # Pm = blkdiag(P, A^T, 0), Am = blkdiag(A, P^T, 0), Bm = blkdiag(B, B^T, 0)
    # sigmoid(y) > 0.5  <=>  y > 0  -> no transcendental.
    # block(0,0) -> pert = thresh(P@A+B);  block(1,1) -> pert^T; rest -> 0.
    t = ((jnp.dot(rd("pm"), rd("am"), preferred_element_type=f32) + rd("bm"))
         > 0).astype(f32)
    wr("pert", t[:n, :n])

    # block-diag aggregation matrix for the 3 stacked predictor variants:
    # base3 = blkdiag(A^T+I, I, A^T+I);  add pert^T into the middle block
    # (zero out t's block(0,0) which holds the non-transposed pert).
    rows = jax.lax.broadcasted_iota(jnp.int32, (n3, n3), 0)
    cols = jax.lax.broadcasted_iota(jnp.int32, (n3, n3), 1)
    blk00 = (rows < n) & (cols < n)
    ahat_bf = (rd("base3") + jnp.where(blk00, 0.0, t)).astype(bf16)

    # --- attribute masking (f32, exact) --------------------------------------
    mask = (rd("m") > 0).astype(f32)
    wr("mask", mask)
    attrs = rd("attrs")
    masked = mask * attrs
    wr("masked", masked)

    # --- batched predictor over 3 variants -----------------------------------
    # variant 0: (attrs, A)  variant 1: (attrs, pert)  variant 2: (masked, A)
    x = jnp.concatenate([attrs, attrs, masked], axis=0)          # [3N, D] f32

    for l in range(num_gnn_layers):
        # GIN aggregation (eps=0): Ahat @ x  ==  adj^T x + x   (per variant)
        h = jnp.dot(ahat_bf, x.astype(bf16), preferred_element_type=f32)
        # GINConv's nn = MLP([2D, 2D, D]) with tanh after every Linear
        for i in range(3):
            w = rd(f"g{l}_{i}_w").astype(bf16)
            b = rd(f"g{l}_{i}_b")                                 # [1, out] f32
            h = jnp.tanh(jnp.dot(h.astype(bf16), w,
                                 preferred_element_type=f32) + b)
        # outer GNN activation (double tanh matches the reference exactly)
        x = jnp.tanh(h)

    # scatter_mean pooling for all 3 variants as one block-diag matmul,
    # then the predictor MLP([16, 8, 2]) with tanh after every Linear.
    g = jnp.dot(rd("pool3").astype(bf16), x.astype(bf16),
                preferred_element_type=f32)                       # [3G, D]
    for i in range(num_mlp_layers):
        w = rd(f"m{i}_w").astype(bf16)
        b = rd(f"m{i}_b")
        g = jnp.tanh(jnp.dot(g.astype(bf16), w,
                             preferred_element_type=f32) + b)
    wr("pred", g)


# ------------------------------ jitted glue ----------------------------------

@functools.partial(jax.jit, static_argnames=("num_graphs",))
def _forward_impl(perturb_mats, perturb_biases, mask_mats, pred_params,
                  edge_index, attrs, bvec, *, num_graphs):
    n, d = attrs.shape
    n3 = 3 * n
    attrs = attrs.astype(jnp.float32)

    p = block_diag(perturb_mats)                     # [n, n]
    bb = block_diag(perturb_biases)                  # [n, n]
    m = jnp.concatenate(mask_mats, axis=0)           # [n, d]

    # dense adjacency (duplicate edges sum, like torch sparse_coo -> dense)
    a = jnp.zeros((n, n), jnp.float32).at[edge_index[0], edge_index[1]].add(1.0)
    a_t = a.T
    eye_n = jnp.eye(n, dtype=jnp.float32)
    zer = jnp.zeros((n, n), jnp.float32)

    # block-diag operands: one matmul yields pert (blk 0) and pert^T (blk 1)
    pm = block_diag([p, a_t, zer])
    am = block_diag([a, p.T, zer])
    bm = block_diag([bb, bb.T, zer])
    base3 = block_diag([a_t + eye_n, eye_n, a_t + eye_n])

    # scatter_mean as a pooling matmul, extended to the 3 stacked variants
    onehot = (bvec[None, :] == jnp.arange(num_graphs)[:, None]).astype(jnp.float32)
    counts = jnp.maximum(onehot.sum(axis=1, keepdims=True), 1.0)
    pool = onehot / counts                                    # [G, N]
    pool3 = jnp.kron(jnp.eye(3, dtype=jnp.float32), pool)     # [3G, 3N]

    gnn_params = pred_params["gnn"]
    mlp_params = pred_params["mlp"]
    out_dim = mlp_params[-1][0].shape[1]

    # ---- pack EVERYTHING into one f32 slab (one prologue DMA) ---------------
    lay = _Layout()
    pieces = {"pm": pm, "am": am, "bm": bm, "base3": base3,
              "m": m, "attrs": attrs, "pool3": pool3}
    lay.add("pm", (n3, n3)); lay.add("am", (n3, n3)); lay.add("bm", (n3, n3))
    lay.add("base3", (n3, n3))
    lay.add("m", (n, d)); lay.add("attrs", (n, d))
    lay.add("pool3", (3 * num_graphs, n3))
    for l, layer in enumerate(gnn_params):
        for i, (w, b) in enumerate(layer):
            lay.add(f"g{l}_{i}_w", w.shape); pieces[f"g{l}_{i}_w"] = w
            lay.add(f"g{l}_{i}_b", (1, b.shape[0]))
            pieces[f"g{l}_{i}_b"] = b.reshape(1, -1)
    for i, (w, b) in enumerate(mlp_params):
        lay.add(f"m{i}_w", w.shape); pieces[f"m{i}_w"] = w
        lay.add(f"m{i}_b", (1, b.shape[0])); pieces[f"m{i}_b"] = b.reshape(1, -1)

    slab = jnp.zeros((lay.rows, lay.width), jnp.float32)
    for name, val in pieces.items():
        r0, (h, wd) = lay.pieces[name]
        slab = slab.at[r0:r0 + h, :wd].set(val.astype(jnp.float32))

    # ---- one merged output slab (one epilogue DMA) ---------------------------
    olay = _Layout()
    olay.add("pert", (n, n))
    olay.add("mask", (n, d))
    olay.add("masked", (n, d))
    olay.add("pred", (3 * num_graphs, out_dim))

    out = pl.pallas_call(
        functools.partial(_generator_kernel, in_layout=lay, out_layout=olay,
                          n=n, num_gnn_layers=len(gnn_params),
                          num_mlp_layers=len(mlp_params)),
        out_shape=jax.ShapeDtypeStruct((olay.rows, olay.width), jnp.float32),
        in_specs=[pl.BlockSpec(memory_space=pltpu.MemorySpace.VMEM)],
        out_specs=pl.BlockSpec(memory_space=pltpu.MemorySpace.VMEM),
    )(slab)

    def oread(name):
        r0, (h, wd) = olay.pieces[name]
        return out[r0:r0 + h, :wd]

    pert_adj = oread("pert")
    mask_bin = oread("mask")
    masked_attrs = oread("masked")
    pred_all = oread("pred")
    pred = pred_all[:num_graphs]
    pred_pert = pred_all[num_graphs:2 * num_graphs]
    pred_mask = pred_all[2 * num_graphs:]

    # jit-compatible (fixed-size, padded) COO indices of the perturbed
    # adjacency -> no device->host sync in the hot path.
    src_idx, dst_idx = jnp.nonzero(pert_adj, size=n * n, fill_value=-1)
    pert_edge_index = jnp.stack([src_idx, dst_idx]).astype(jnp.int32)
    num_pert_edges = jnp.sum(pert_adj).astype(jnp.int32)

    return (a, pert_adj, mask_bin, masked_attrs, pred, pred_pert, pred_mask,
            pert_edge_index, num_pert_edges)


def generator_forward(params, batch):
    ids = list(batch["id"])
    num_graphs = len(ids)

    (adj, pert_adj, mask_bin, masked_attrs, pred, pred_pert, pred_mask,
     pert_edge_index, num_pert_edges) = _forward_impl(
        tuple(params["perturb_mat"][i] for i in ids),
        tuple(params["perturb_bias"][i] for i in ids),
        tuple(params["mask_mat"][i] for i in ids),
        params["predictor"],
        batch["edge_index"], batch["attrs"], batch["batch"],
        num_graphs=num_graphs)

    # TODO(synk): torch's .to_sparse().indices() has a data-dependent length;
    # here the perturbed edge list is fixed-size [2, N*N], padded with -1, and
    # accompanied by num_edges so downstream can trim without a host sync.
    batch_perturbation = dict(batch, edge_index=pert_edge_index,
                              num_edges=num_pert_edges)
    batch_masking = dict(batch, attrs=masked_attrs)

    return (adj, pert_adj, mask_bin, pred, pred_pert, pred_mask,
            batch_perturbation, batch_masking)


# --------------------------- example / main ----------------------------------

def xavier_uniform(key, shape, gain):
    fan_in, fan_out = shape[0], shape[1]
    bound = gain * (6.0 / (fan_in + fan_out)) ** 0.5
    return jax.random.uniform(key, shape, jnp.float32, -bound, bound)


if __name__ == "__main__":
    key = jax.random.PRNGKey(0)
    keys = iter(jax.random.split(key, 64))

    attrs_dim = 8
    graphs_num = 3
    nodes_num_list = [8, 8, 8]
    gnn_layers_num = 2
    gain = 5.0 / 3.0

    params = {
        "perturb_mat": [xavier_uniform(next(keys), (nn_, nn_), gain)
                        for nn_ in nodes_num_list],
        "perturb_bias": [xavier_uniform(next(keys), (nn_, nn_), gain)
                         for nn_ in nodes_num_list],
        "mask_mat": [xavier_uniform(next(keys), (nn_, attrs_dim), gain)
                     for nn_ in nodes_num_list],
    }

    gnn_params = []
    for _ in range(gnn_layers_num):
        dims = [attrs_dim, 2 * attrs_dim, 2 * attrs_dim, attrs_dim]
        layer = []
        for i in range(3):
            w = xavier_uniform(next(keys), (dims[i], dims[i + 1]), 1.0)
            b = jax.random.uniform(next(keys), (dims[i + 1],), jnp.float32, -0.1, 0.1)
            layer.append((w, b))
        gnn_params.append(layer)

    mlp_dims = [attrs_dim, 16, 8, 2]
    mlp_params = []
    for i in range(3):
        w = xavier_uniform(next(keys), (mlp_dims[i], mlp_dims[i + 1]), 1.0)
        b = jax.random.uniform(next(keys), (mlp_dims[i + 1],), jnp.float32, -0.1, 0.1)
        mlp_params.append((w, b))

    params["predictor"] = {"gnn": gnn_params, "mlp": mlp_params}

    # 2-graph batch (graph ids 0 and 2), each an 8-node bidirectional ring.
    ids = [0, 2]
    src, dst, bvec = [], [], []
    off = 0
    for g, gid in enumerate(ids):
        nn_ = nodes_num_list[gid]
        for i in range(nn_):
            src += [off + i, off + (i + 1) % nn_]
            dst += [off + (i + 1) % nn_, off + i]
        bvec += [g] * nn_
        off += nn_
    num_nodes = off

    batch = {
        "id": ids,
        "edge_index": jnp.array([src, dst], dtype=jnp.int32),
        "attrs": jax.random.normal(next(keys), (num_nodes, attrs_dim), jnp.float32),
        "batch": jnp.array(bvec, dtype=jnp.int32),
        "num_nodes": num_nodes,
    }

    outs = generator_forward(params, batch)
    jax.block_until_ready(outs)
    print("KERNEL_OK")
</pallas_src>

<mosaic_0001>
module attributes {stable_mosaic.version = 11 : i64} {
  func.func @_generator_kernel(%arg0: memref<416x48xf32, #tpu.memory_space<vmem>>, %arg1: memref<56x16xf32, #tpu.memory_space<vmem>>) attributes {dimension_semantics = [], scalar_prefetch = 0 : i64, scratch_operands = 0 : i64, tpu.core_type = #tpu.core_type<tc>} {
    %cst = arith.constant 0.000000e+00 : f32
    %0 = vector.broadcast %cst : f32 to vector<56x16xf32>
    %c0 = arith.constant 0 : index
    %c0_0 = arith.constant 0 : index
    %1 = vector.load %arg1[%c0, %c0_0] : memref<56x16xf32, #tpu.memory_space<vmem>>, vector<56x16xf32>
    tpu.vector_store %arg1[%c0, %c0_0], %0 {strides = array<i32>} : memref<56x16xf32, #tpu.memory_space<vmem>>, vector<56x16xf32>,
    %c0_1 = arith.constant 0 : index
    %c0_2 = arith.constant 0 : index
    %2 = vector.load %arg0[%c0_1, %c0_2] : memref<416x48xf32, #tpu.memory_space<vmem>>, vector<48x48xf32>
    %c48 = arith.constant 48 : index
    %c0_3 = arith.constant 0 : index
    %3 = vector.load %arg0[%c48, %c0_3] : memref<416x48xf32, #tpu.memory_space<vmem>>, vector<48x48xf32>
    %cst_4 = arith.constant dense<0.000000e+00> : vector<48x48xf32>
    %4 = tpu.matmul %2, %3, %cst_4 {dimension_numbers = #tpu.dot_dimension_numbers<[1], [0], [0], [1], [0, 0, 1, 1], [], []>} : vector<48x48xf32>, vector<48x48xf32>, vector<48x48xf32> -> vector<48x48xf32>
    %c96 = arith.constant 96 : index
    %c0_5 = arith.constant 0 : index
    %5 = vector.load %arg0[%c96, %c0_5] : memref<416x48xf32, #tpu.memory_space<vmem>>, vector<48x48xf32>
    %6 = arith.addf %4, %5 : vector<48x48xf32>
    %cst_6 = arith.constant 0.000000e+00 : f32
    %7 = vector.broadcast %cst_6 : f32 to vector<48x48xf32>
    %8 = arith.cmpf ogt, %6, %7 : vector<48x48xf32>
    %9 = arith.extui %8 : vector<48x48xi1> to vector<48x48xi32>
    %10 = arith.sitofp %9 : vector<48x48xi32> to vector<48x48xf32>
    %11 = vector.extract_strided_slice %10 {offsets = [0, 0], sizes = [16, 16], strides = [1, 1]} : vector<48x48xf32> to vector<16x16xf32>
    %c0_7 = arith.constant 0 : index
    %c0_8 = arith.constant 0 : index
    %12 = vector.load %arg1[%c0_7, %c0_8] : memref<56x16xf32, #tpu.memory_space<vmem>>, vector<16x16xf32>
    tpu.vector_store %arg1[%c0_7, %c0_8], %11 {strides = array<i32>} : memref<56x16xf32, #tpu.memory_space<vmem>>, vector<16x16xf32>,
    %13 = tpu.iota {dimensions = array<i32: 0>} : vector<48x48xi32>
    %14 = tpu.iota {dimensions = array<i32: 1>} : vector<48x48xi32>
    %c16_i32 = arith.constant 16 : i32
    %15 = vector.broadcast %c16_i32 : i32 to vector<48x48xi32>
    %16 = arith.cmpi slt, %13, %15 : vector<48x48xi32>
    %c16_i32_9 = arith.constant 16 : i32
    %17 = vector.broadcast %c16_i32_9 : i32 to vector<48x48xi32>
    %18 = arith.cmpi slt, %14, %17 : vector<48x48xi32>
    %19 = arith.andi %16, %18 : vector<48x48xi1>
    %c144 = arith.constant 144 : index
    %c0_10 = arith.constant 0 : index
    %20 = vector.load %arg0[%c144, %c0_10] : memref<416x48xf32, #tpu.memory_space<vmem>>, vector<48x48xf32>
    %cst_11 = arith.constant 0.000000e+00 : f32
    %21 = vector.broadcast %cst_11 : f32 to vector<48x48xf32>
    %22 = arith.select %19, %21, %10 : vector<48x48xi1>, vector<48x48xf32>
    %23 = arith.addf %20, %22 : vector<48x48xf32>
    %24 = arith.truncf %23 : vector<48x48xf32> to vector<48x48xbf16>
    %c192 = arith.constant 192 : index
    %c0_12 = arith.constant 0 : index
    %25 = vector.load %arg0[%c192, %c0_12] : memref<416x48xf32, #tpu.memory_space<vmem>>, vector<16x8xf32>
    %cst_13 = arith.constant 0.000000e+00 : f32
    %26 = vector.broadcast %cst_13 : f32 to vector<16x8xf32>
    %27 = arith.cmpf ogt, %25, %26 : vector<16x8xf32>
    %28 = arith.extui %27 : vector<16x8xi1> to vector<16x8xi32>
    %29 = arith.sitofp %28 : vector<16x8xi32> to vector<16x8xf32>
    %c16 = arith.constant 16 : index
    %c0_14 = arith.constant 0 : index
    %30 = vector.load %arg1[%c16, %c0_14] : memref<56x16xf32, #tpu.memory_space<vmem>>, vector<16x8xf32>
    tpu.vector_store %arg1[%c16, %c0_14], %29 {strides = array<i32>} : memref<56x16xf32, #tpu.memory_space<vmem>>, vector<16x8xf32>,
    %c208 = arith.constant 208 : index
    %c0_15 = arith.constant 0 : index
    %31 = vector.load %arg0[%c208, %c0_15] : memref<416x48xf32, #tpu.memory_space<vmem>>, vector<16x8xf32>
    %32 = arith.mulf %29, %31 : vector<16x8xf32>
    %c32 = arith.constant 32 : index
    %c0_16 = arith.constant 0 : index
    %33 = vector.load %arg1[%c32, %c0_16] : memref<56x16xf32, #tpu.memory_space<vmem>>, vector<16x8xf32>
    tpu.vector_store %arg1[%c32, %c0_16], %32 {strides = array<i32>} : memref<56x16xf32, #tpu.memory_space<vmem>>, vector<16x8xf32>,
    %34 = tpu.concatenate %31, %31, %32 in 0 : vector<16x8xf32>, vector<16x8xf32>, vector<16x8xf32> -> vector<48x8xf32>
    %35 = arith.truncf %34 : vector<48x8xf32> to vector<48x8xbf16>
    %cst_17 = arith.constant dense<0.000000e+00> : vector<48x8xf32>
    %36 = tpu.matmul %24, %35, %cst_17 {dimension_numbers = #tpu.dot_dimension_numbers<[1], [0], [0], [1], [0, 0, 1, 1], [], []>} : vector<48x48xbf16>, vector<48x8xbf16>, vector<48x8xf32> -> vector<48x8xf32>
    %c232 = arith.constant 232 : index
    %c0_18 = arith.constant 0 : index
    %37 = vector.load %arg0[%c232, %c0_18] : memref<416x48xf32, #tpu.memory_space<vmem>>, vector<8x16xf32>
    %38 = arith.truncf %37 : vector<8x16xf32> to vector<8x16xbf16>
    %c240 = arith.constant 240 : index
    %c0_19 = arith.constant 0 : index
    %39 = vector.load %arg0[%c240, %c0_19] : memref<416x48xf32, #tpu.memory_space<vmem>>, vector<1x16xf32>
    %40 = arith.truncf %36 : vector<48x8xf32> to vector<48x8xbf16>
    %cst_20 = arith.constant dense<0.000000e+00> : vector<48x16xf32>
    %41 = tpu.matmul %40, %38, %cst_20 {dimension_numbers = #tpu.dot_dimension_numbers<[1], [0], [0], [1], [0, 0, 1, 1], [], []>} : vector<48x8xbf16>, vector<8x16xbf16>, vector<48x16xf32> -> vector<48x16xf32>
    %42 = vector.broadcast %39 : vector<1x16xf32> to vector<48x16xf32>
    %43 = arith.addf %41, %42 : vector<48x16xf32>
    %44 = math.tanh %43 : vector<48x16xf32>
    %c248 = arith.constant 248 : index
    %c0_21 = arith.constant 0 : index
    %45 = vector.load %arg0[%c248, %c0_21] : memref<416x48xf32, #tpu.memory_space<vmem>>, vector<16x16xf32>
    %46 = arith.truncf %45 : vector<16x16xf32> to vector<16x16xbf16>
    %c264 = arith.constant 264 : index
    %c0_22 = arith.constant 0 : index
    %47 = vector.load %arg0[%c264, %c0_22] : memref<416x48xf32, #tpu.memory_space<vmem>>, vector<1x16xf32>
    %48 = arith.truncf %44 : vector<48x16xf32> to vector<48x16xbf16>
    %cst_23 = arith.constant dense<0.000000e+00> : vector<48x16xf32>
    %49 = tpu.matmul %48, %46, %cst_23 {dimension_numbers = #tpu.dot_dimension_numbers<[1], [0], [0], [1], [0, 0, 1, 1], [], []>} : vector<48x16xbf16>, vector<16x16xbf16>, vector<48x16xf32> -> vector<48x16xf32>
    %50 = vector.broadcast %47 : vector<1x16xf32> to vector<48x16xf32>
    %51 = arith.addf %49, %50 : vector<48x16xf32>
    %52 = math.tanh %51 : vector<48x16xf32>
    %c272 = arith.constant 272 : index
    %c0_24 = arith.constant 0 : index
    %53 = vector.load %arg0[%c272, %c0_24] : memref<416x48xf32, #tpu.memory_space<vmem>>, vector<16x8xf32>
    %54 = arith.truncf %53 : vector<16x8xf32> to vector<16x8xbf16>
    %c288 = arith.constant 288 : index
    %c0_25 = arith.constant 0 : index
    %55 = vector.load %arg0[%c288, %c0_25] : memref<416x48xf32, #tpu.memory_space<vmem>>, vector<1x8xf32>
    %56 = arith.truncf %52 : vector<48x16xf32> to vector<48x16xbf16>
    %cst_26 = arith.constant dense<0.000000e+00> : vector<48x8xf32>
    %57 = tpu.matmul %56, %54, %cst_26 {dimension_numbers = #tpu.dot_dimension_numbers<[1], [0], [0], [1], [0, 0, 1, 1], [], []>} : vector<48x16xbf16>, vector<16x8xbf16>, vector<48x8xf32> -> vector<48x8xf32>
    %58 = vector.broadcast %55 : vector<1x8xf32> to vector<48x8xf32>
    %59 = arith.addf %57, %58 : vector<48x8xf32>
    %60 = math.tanh %59 : vector<48x8xf32>
    %61 = math.tanh %60 : vector<48x8xf32>
    %62 = arith.truncf %61 : vector<48x8xf32> to vector<48x8xbf16>
    %cst_27 = arith.constant dense<0.000000e+00> : vector<48x8xf32>
    %63 = tpu.matmul %24, %62, %cst_27 {dimension_numbers = #tpu.dot_dimension_numbers<[1], [0], [0], [1], [0, 0, 1, 1], [], []>} : vector<48x48xbf16>, vector<48x8xbf16>, vector<48x8xf32> -> vector<48x8xf32>
    %c296 = arith.constant 296 : index
    %c0_28 = arith.constant 0 : index
    %64 = vector.load %arg0[%c296, %c0_28] : memref<416x48xf32, #tpu.memory_space<vmem>>, vector<8x16xf32>
    %65 = arith.truncf %64 : vector<8x16xf32> to vector<8x16xbf16>
    %c304 = arith.constant 304 : index
    %c0_29 = arith.constant 0 : index
    %66 = vector.load %arg0[%c304, %c0_29] : memref<416x48xf32, #tpu.memory_space<vmem>>, vector<1x16xf32>
    %67 = arith.truncf %63 : vector<48x8xf32> to vector<48x8xbf16>
    %cst_30 = arith.constant dense<0.000000e+00> : vector<48x16xf32>
    %68 = tpu.matmul %67, %65, %cst_30 {dimension_numbers = #tpu.dot_dimension_numbers<[1], [0], [0], [1], [0, 0, 1, 1], [], []>} : vector<48x8xbf16>, vector<8x16xbf16>, vector<48x16xf32> -> vector<48x16xf32>
    %69 = vector.broadcast %66 : vector<1x16xf32> to vector<48x16xf32>
    %70 = arith.addf %68, %69 : vector<48x16xf32>
    %71 = math.tanh %70 : vector<48x16xf32>
    %c312 = arith.constant 312 : index
    %c0_31 = arith.constant 0 : index
    %72 = vector.load %arg0[%c312, %c0_31] : memref<416x48xf32, #tpu.memory_space<vmem>>, vector<16x16xf32>
    %73 = arith.truncf %72 : vector<16x16xf32> to vector<16x16xbf16>
    %c328 = arith.constant 328 : index
    %c0_32 = arith.constant 0 : index
    %74 = vector.load %arg0[%c328, %c0_32] : memref<416x48xf32, #tpu.memory_space<vmem>>, vector<1x16xf32>
    %75 = arith.truncf %71 : vector<48x16xf32> to vector<48x16xbf16>
    %cst_33 = arith.constant dense<0.000000e+00> : vector<48x16xf32>
    %76 = tpu.matmul %75, %73, %cst_33 {dimension_numbers = #tpu.dot_dimension_numbers<[1], [0], [0], [1], [0, 0, 1, 1], [], []>} : vector<48x16xbf16>, vector<16x16xbf16>, vector<48x16xf32> -> vector<48x16xf32>
    %77 = vector.broadcast %74 : vector<1x16xf32> to vector<48x16xf32>
    %78 = arith.addf %76, %77 : vector<48x16xf32>
    %79 = math.tanh %78 : vector<48x16xf32>
    %c336 = arith.constant 336 : index
    %c0_34 = arith.constant 0 : index
    %80 = vector.load %arg0[%c336, %c0_34] : memref<416x48xf32, #tpu.memory_space<vmem>>, vector<16x8xf32>
    %81 = arith.truncf %80 : vector<16x8xf32> to vector<16x8xbf16>
    %c352 = arith.constant 352 : index
    %c0_35 = arith.constant 0 : index
    %82 = vector.load %arg0[%c352, %c0_35] : memref<416x48xf32, #tpu.memory_space<vmem>>, vector<1x8xf32>
    %83 = arith.truncf %79 : vector<48x16xf32> to vector<48x16xbf16>
    %cst_36 = arith.constant dense<0.000000e+00> : vector<48x8xf32>
    %84 = tpu.matmul %83, %81, %cst_36 {dimension_numbers = #tpu.dot_dimension_numbers<[1], [0], [0], [1], [0, 0, 1, 1], [], []>} : vector<48x16xbf16>, vector<16x8xbf16>, vector<48x8xf32> -> vector<48x8xf32>
    %85 = vector.broadcast %82 : vector<1x8xf32> to vector<48x8xf32>
    %86 = arith.addf %84, %85 : vector<48x8xf32>
    %87 = math.tanh %86 : vector<48x8xf32>
    %88 = math.tanh %87 : vector<48x8xf32>
    %c224 = arith.constant 224 : index
    %c0_37 = arith.constant 0 : index
    %89 = vector.load %arg0[%c224, %c0_37] : memref<416x48xf32, #tpu.memory_space<vmem>>, vector<6x48xf32>
    %90 = arith.truncf %89 : vector<6x48xf32> to vector<6x48xbf16>
    %91 = arith.truncf %88 : vector<48x8xf32> to vector<48x8xbf16>
    %cst_38 = arith.constant dense<0.000000e+00> : vector<6x8xf32>
    %92 = tpu.matmul %90, %91, %cst_38 {dimension_numbers = #tpu.dot_dimension_numbers<[1], [0], [0], [1], [0, 0, 1, 1], [], []>} : vector<6x48xbf16>, vector<48x8xbf16>, vector<6x8xf32> -> vector<6x8xf32>
    %c360 = arith.constant 360 : index
    %c0_39 = arith.constant 0 : index
    %93 = vector.load %arg0[%c360, %c0_39] : memref<416x48xf32, #tpu.memory_space<vmem>>, vector<8x16xf32>
    %94 = arith.truncf %93 : vector<8x16xf32> to vector<8x16xbf16>
    %c368 = arith.constant 368 : index
    %c0_40 = arith.constant 0 : index
    %95 = vector.load %arg0[%c368, %c0_40] : memref<416x48xf32, #tpu.memory_space<vmem>>, vector<1x16xf32>
    %96 = arith.truncf %92 : vector<6x8xf32> to vector<6x8xbf16>
    %cst_41 = arith.constant dense<0.000000e+00> : vector<6x16xf32>
    %97 = tpu.matmul %96, %94, %cst_41 {dimension_numbers = #tpu.dot_dimension_numbers<[1], [0], [0], [1], [0, 0, 1, 1], [], []>} : vector<6x8xbf16>, vector<8x16xbf16>, vector<6x16xf32> -> vector<6x16xf32>
    %98 = vector.broadcast %95 : vector<1x16xf32> to vector<6x16xf32>
    %99 = arith.addf %97, %98 : vector<6x16xf32>
    %100 = math.tanh %99 : vector<6x16xf32>
    %c376 = arith.constant 376 : index
    %c0_42 = arith.constant 0 : index
    %101 = vector.load %arg0[%c376, %c0_42] : memref<416x48xf32, #tpu.memory_space<vmem>>, vector<16x8xf32>
    %102 = arith.truncf %101 : vector<16x8xf32> to vector<16x8xbf16>
    %c392 = arith.constant 392 : index
    %c0_43 = arith.constant 0 : index
    %103 = vector.load %arg0[%c392, %c0_43] : memref<416x48xf32, #tpu.memory_space<vmem>>, vector<1x8xf32>
    %104 = arith.truncf %100 : vector<6x16xf32> to vector<6x16xbf16>
    %cst_44 = arith.constant dense<0.000000e+00> : vector<6x8xf32>
    %105 = tpu.matmul %104, %102, %cst_44 {dimension_numbers = #tpu.dot_dimension_numbers<[1], [0], [0], [1], [0, 0, 1, 1], [], []>} : vector<6x16xbf16>, vector<16x8xbf16>, vector<6x8xf32> -> vector<6x8xf32>
    %106 = vector.broadcast %103 : vector<1x8xf32> to vector<6x8xf32>
    %107 = arith.addf %105, %106 : vector<6x8xf32>
    %108 = math.tanh %107 : vector<6x8xf32>
    %c400 = arith.constant 400 : index
    %c0_45 = arith.constant 0 : index
    %109 = vector.load %arg0[%c400, %c0_45] : memref<416x48xf32, #tpu.memory_space<vmem>>, vector<8x2xf32>
    %110 = arith.truncf %109 : vector<8x2xf32> to vector<8x2xbf16>
    %c408 = arith.constant 408 : index
    %c0_46 = arith.constant 0 : index
    %111 = vector.load %arg0[%c408, %c0_46] : memref<416x48xf32, #tpu.memory_space<vmem>>, vector<1x2xf32>
    %112 = arith.truncf %108 : vector<6x8xf32> to vector<6x8xbf16>
    %cst_47 = arith.constant dense<0.000000e+00> : vector<6x2xf32>
    %113 = tpu.matmul %112, %110, %cst_47 {dimension_numbers = #tpu.dot_dimension_numbers<[1], [0], [0], [1], [0, 0, 1, 1], [], []>} : vector<6x8xbf16>, vector<8x2xbf16>, vector<6x2xf32> -> vector<6x2xf32>
    %114 = vector.broadcast %111 : vector<1x2xf32> to vector<6x2xf32>
    %115 = arith.addf %113, %114 : vector<6x2xf32>
    %116 = math.tanh %115 : vector<6x2xf32>
    %c48_48 = arith.constant 48 : index
    %c0_49 = arith.constant 0 : index
    %117 = vector.load %arg1[%c48_48, %c0_49] : memref<56x16xf32, #tpu.memory_space<vmem>>, vector<6x2xf32>
    tpu.vector_store %arg1[%c48_48, %c0_49], %116 {strides = array<i32>} : memref<56x16xf32, #tpu.memory_space<vmem>>, vector<6x2xf32>,
    return
  }
}

</mosaic_0001>

<bundles_post_ra>
// kernel: _forward_impl.1
= control target key start
LH: loop header
LB: loop body
LE: loop exit
PB: predicated region body
PF: predicated region fallthrough
CT: control target
= control target key end

     0   :  { %vm35_vm0 = vcmask 392192   ;;  %vm9_vm1 = vcmask 130048   ;;  %v785_v8 = vmov 0.0   ;;  %vm160_vm4 = vcmask 64512   ;;  %s1072_s0 = inlined_call_operand.vmem [shape: f32[416,48], index: 0, kind: input, shape index: {}]   ;;  %s1073_s1 = inlined_call_operand.vmem [shape: f32[56,16], index: 1, kind: output, shape index: {}]  }
   0x1   :  { %v28_v0 = vld [vmem:[%s1072_s0 + $0x58] sm:$0xff]  ;;  %v27_v1 = vld [vmem:[%s1072_s0 + $0x50] sm:$0xff]  ;;  %v26_v2 = vld [vmem:[%s1072_s0 + $0x48] sm:$0xff]  ;;  %10 = vst.msk [vmem:[%s1073_s1] sm:$0xff] %vm9_vm1, %v785_v8  ;;  %v116_v25 = vlaneseq  ;;  %vm220_vm12 = vcmask 1043456   ;;  %vm624_vm13 = vcmask 13312  }
   0x2   :  { %64 = vmatpush.msra.mxu0 %v28_v0  ;;  %v25_v3 = vld [vmem:[%s1072_s0 + $0x40] sm:$0xff]  ;;  %v24_v4 = vld [vmem:[%s1072_s0 + $0x38] sm:$0xff]  ;;  %v23_v5 = vld [vmem:[%s1072_s0 + $0x30] sm:$0xff]  ;;  %11 = vst.msk [vmem:[%s1073_s1 + $0x8] sm:$0xff] %vm9_vm1, %v785_v8 }
   0x3   :  { %v17_v6 = vld [vmem:[%s1072_s0] sm:$0xff]  ;;  %v18_v7 = vld [vmem:[%s1072_s0 + $0x8] sm:$0xff]  ;;  %12 = vst.msk [vmem:[%s1073_s1 + $0x10] sm:$0xff] %vm9_vm1, %v785_v8  ;;  %v19_v9 = vld [vmem:[%s1072_s0 + $0x10] sm:$0xff]  ;;  %v117_v28 = vand.u32 127, %v116_v25 }
   0x4   :  { %65 = vmatpush.msra.mxu0 %v27_v1  ;;  %13 = vst.msk [vmem:[%s1073_s1 + $0x18] sm:$0xff] %vm9_vm1, %v785_v8  ;;  %v20_v10 = vld [vmem:[%s1072_s0 + $0x18] sm:$0xff]  ;;  %v21_v11 = vld [vmem:[%s1072_s0 + $0x20] sm:$0xff]  ;;  %v22_v12 = vld [vmem:[%s1072_s0 + $0x28] sm:$0xff] }
   0x5   :  { %14 = vst.msk [vmem:[%s1073_s1 + $0x20] sm:$0xff] %vm9_vm1, %v785_v8  ;;  %v152_v13 = vld [vmem:[%s1072_s0 + $0xc0] sm:$0xff]  ;;  %v153_v14 = vld [vmem:[%s1072_s0 + $0xc8] sm:$0xff]  ;;  %v163_v17 = vld [vmem:[%s1072_s0 + $0xd0] sm:$0xff]  ;;  %vm124_vm6 = vcmp.lt.s32.totalorder %v117_v28, 16 }
   0x6   :  { %66 = vmatpush.msra.mxu0 %v26_v2  ;;  %15 = vst.msk [vmem:[%s1073_s1 + $0x28] sm:$0xff] %vm9_vm1, %v785_v8  ;;  %vm154_vm2 = vcmp.gt.f32.partialorder %v152_v13, 0.0  ;;  %vm155_vm3 = vcmp.gt.f32.partialorder %v153_v14, 0.0  ;;  %v164_v18 = vld [vmem:[%s1072_s0 + $0xd8] sm:$0xff]  ;;  %v29_v23 = vld [vmem:[%s1072_s0 + $0x60] sm:$0xff]  ;;  %v30_v29 = vld [vmem:[%s1072_s0 + $0x68] sm:$0xff] }
   0x7   :  { %16 = vst.msk [vmem:[%s1073_s1 + $0x30] sm:$0xff] %vm9_vm1, %v785_v8  ;;  %v642_v15 = vsel %vm154_vm2, 1.0, %v785_v8  ;;  %v643_v16 = vsel %vm155_vm3, 1.0, %v785_v8  ;;  %v169_v22 = vpack.c.bf16 %v164_v18, %v163_v17  ;;  %v131_v32 = vld [vmem:[%s1072_s0 + $0x90] sm:$0xff]  ;;  %v132_v34 = vld [vmem:[%s1072_s0 + $0x98] sm:$0xff]  ;;  %v133_v47 = vld [vmem:[%s1072_s0 + $0xa0] sm:$0xff] }
   0x8   :  { %67 = vmatpush.msra.mxu0 %v25_v3  ;;  %v165_v19 = vmul.f32 %v642_v15, %v163_v17  ;;  %v166_v20 = vmul.f32 %v643_v16, %v164_v18  ;;  %161 = vst.msk [vmem:[%s1073_s1 + $0x10] sm:$0xff] %vm160_vm4, %v642_v15  ;;  %v31_v39 = vld [vmem:[%s1072_s0 + $0x70] sm:$0xff]  ;;  %v32_v43 = vld [vmem:[%s1072_s0 + $0x78] sm:$0xff]  ;;  %v134_v48 = vld [vmem:[%s1072_s0 + $0xa8] sm:$0xff] }
   0x9   :  { %162 = vst.msk [vmem:[%s1073_s1 + $0x18] sm:$0xff] %vm160_vm4, %v643_v16  ;;  %v33_v53 = vld [vmem:[%s1072_s0 + $0x80] sm:$0xff]  ;;  %v34_v56 = vld [vmem:[%s1072_s0 + $0x88] sm:$0xff]  ;;  %v135_v60 = vld [vmem:[%s1072_s0 + $0xb0] sm:$0xff] }
   0xa   :  { %68 = vmatpush.msra.mxu0 %v24_v4  ;;  %v170_v21 = vpack.c.bf16 %v166_v20, %v165_v19  ;;  %167 = vst.msk [vmem:[%s1073_s1 + $0x20] sm:$0xff] %vm160_vm4, %v165_v19  ;;  %v136_v61 = vld [vmem:[%s1072_s0 + $0xb8] sm:$0xff]  ;;  %v204_v2 = vld [vmem:[%s1072_s0 + $0xe8] sm:$0xff]  ;;  %v255_v15 = vld [vmem:[%s1072_s0 + $0x100] sm:$0xff] }
   0xb   :  { %168 = vst.msk [vmem:[%s1073_s1 + $0x28] sm:$0xff] %vm160_vm4, %v166_v20  ;;  %v205_v3 = vpack.c.bf16 %v204_v2, %v204_v2  ;;  %v254_v14 = vld [vmem:[%s1072_s0 + $0xf8] sm:$0xff]  ;;  %v674_v18 = vld [vmem:[%s1072_s0 + $0xf0] ss:$0 sm:$0xff] }
   0xc   :  { %69 = vmatpush.msra.mxu0 %v23_v5  ;;  %185 = vmatpush.bf16.msra.mxu1 %v170_v21  ;;  %v256_v16 = vpack.c.bf16 %v255_v15, %v254_v14 }
   0xd   :  { %630 = vmatmul.msk.f32.vlgmr.msra.gmra.mxu0 %vm35_vm0, %v17_v6  ;;  %v222_v4 = vsel %vm220_vm12, %v205_v3, 0 }
   0xe   :  { %231 = vmatpush.bf16.msrb.mxu0 %v222_v4  ;;  %672 = vmatpush.bf16.msra.mxu2 %v222_v4 }
   0xf   :  { %278 = vmatpush.bf16.msra.mxu3 %v256_v16 }
  0x10   :  { %186 = vmatpush.bf16.msra.mxu1 %v169_v22 }
  0x14   :  { %187 = vmatpush.bf16.msra.mxu1 %v169_v22 }
  0x15   :  { %631 = vmatmul.msk.f32.gmra.mxu0 %vm35_vm0, %v18_v7 }
  0x1d   :  { %632 = vmatmul.msk.f32.gmra.mxu0 %vm35_vm0, %v19_v9 }
  0x25   :  { %633 = vmatmul.msk.f32.gmra.mxu0 %vm35_vm0, %v20_v10 }
  0x2d   :  { %634 = vmatmul.msk.f32.gmra.mxu0 %vm35_vm0, %v21_v11 }
  0x35   :  { %635 = vmatmul.msk.f32.gmra.mxu0 %vm35_vm0, %v22_v12 }
  0x8a   :  { %v71_v24 = vpop.f32.mrf.mxu0 }
  0x8b   :  { %v72_v26 = vadd.f32 %v71_v24, %v29_v23 }
  0x8d   :  { %vm89_vm5 = vcmp.gt.f32.partialorder %v72_v26, 0.0 }
  0x8e   :  { %v636_v27 = vsel %vm89_vm5, 1.0, %v785_v8 }
  0x8f   :  { %107 = vst.msk [vmem:[%s1073_s1] sm:$0xff] %vm9_vm1, %v636_v27  ;;  %v137_v33 = vsel %vm124_vm6, 0.0, %v636_v27 }
  0x90   :  { %v143_v37 = vadd.f32 %v137_v33, %v131_v32 }
  0x92   :  { %v74_v30 = vpop.f32.mrf.mxu0 }
  0x93   :  { %v75_v31 = vadd.f32 %v74_v30, %v30_v29 }
  0x95   :  { %vm90_vm7 = vcmp.gt.f32.partialorder %v75_v31, 0.0 }
  0x96   :  { %v637_v35 = vsel %vm90_vm7, 1.0, %v785_v8 }
  0x97   :  { %108 = vst.msk [vmem:[%s1073_s1 + $0x8] sm:$0xff] %vm9_vm1, %v637_v35  ;;  %v138_v36 = vsel %vm124_vm6, 0.0, %v637_v35 }
  0x98   :  { %v144_v38 = vadd.f32 %v138_v36, %v132_v34 }
  0x9a   :  { %v77_v40 = vpop.f32.mrf.mxu0  ;;  %v928_v41 = vpack.c.bf16 %v144_v38, %v143_v37 }
  0x9b   :  { %v78_v42 = vadd.f32 %v77_v40, %v31_v39  ;;  %v301_v39 = vld [vmem:[%s1072_s0 + $0x110] sm:$0xff]  ;;  %v302_v40 = vld [vmem:[%s1072_s0 + $0x118] sm:$0xff] }
  0x9c   :  { %644 = vmatmul.msk.bf16.vlgmr.msra.gmra.mxu1 %vm35_vm0, %v928_v41 }
  0x9d   :  { %vm91_vm8 = vcmp.gt.f32.partialorder %v78_v42, 0.0  ;;  %v303_v42 = vpack.c.bf16 %v302_v40, %v301_v39  ;;  %v430_v40 = vld [vmem:[%s1072_s0 + $0x138] sm:$0xff] }
  0x9e   :  { %v638_v46 = vsel %vm91_vm8, 1.0, %v785_v8 }
  0x9f   :  { %v145_v50 = vadd.f32 %v638_v46, %v133_v47  ;;  %325 = vmatpush.bf16.msrb.mxu2 %v303_v42  ;;  %v431_v42 = vld [vmem:[%s1072_s0 + $0x140] sm:$0xff] }
  0xa2   :  { %v80_v44 = vpop.f32.mrf.mxu0 }
  0xa3   :  { %v81_v45 = vadd.f32 %v80_v44, %v32_v43  ;;  %v675_v44 = vld [vmem:[%s1072_s0 + $0x108] ss:$0 sm:$0xff] }
  0xa5   :  { %vm92_vm9 = vcmp.gt.f32.partialorder %v81_v45, 0.0 }
  0xa6   :  { %v639_v49 = vsel %vm92_vm9, 1.0, %v785_v8 }
  0xa7   :  { %v146_v51 = vadd.f32 %v639_v49, %v134_v48 }
  0xa9   :  { %v943_v52 = vpack.c.bf16 %v146_v51, %v145_v50 }
  0xaa   :  { %v83_v54 = vpop.f32.mrf.mxu0 }
  0xab   :  { %v84_v55 = vadd.f32 %v83_v54, %v33_v53 }
  0xac   :  { %645 = vmatmul.msk.bf16.gmra.mxu1 %vm35_vm0, %v943_v52 }
  0xad   :  { %vm93_vm10 = vcmp.gt.f32.partialorder %v84_v55, 0.0 }
  0xae   :  { %v640_v59 = vsel %vm93_vm10, 1.0, %v785_v8 }
  0xaf   :  { %v147_v63 = vadd.f32 %v640_v59, %v135_v60 }
  0xb2   :  { %v86_v57 = vpop.f32.mrf.mxu0 }
  0xb3   :  { %v87_v58 = vadd.f32 %v86_v57, %v34_v56 }
  0xb5   :  { %vm94_vm11 = vcmp.gt.f32.partialorder %v87_v58, 0.0 }
  0xb6   :  { %v641_v62 = vsel %vm94_vm11, 1.0, %v785_v8 }
  0xb7   :  { %v148_v0 = vadd.f32 %v641_v62, %v136_v61 }
  0xb9   :  { %v961_v1 = vpack.c.bf16 %v148_v0, %v147_v63 }
  0xbc   :  { %646 = vmatmul.msk.bf16.gmra.mxu1 %vm35_vm0, %v961_v1 }
 0x119   :  { %v189_v5 = vpop.f32.mrf.mxu1 }
 0x121   :  { %v191_v6 = vpop.f32.mrf.mxu1 }
 0x122   :  { %v207_v7 = vpack.c.bf16 %v191_v6, %v189_v5 }
 0x124   :  { %647 = vmatmul.msk.bf16.vlgmr.msrb.gmra.mxu0 %vm160_vm4, %v207_v7 }
 0x129   :  { %v194_v8 = vpop.f32.mrf.mxu1 }
 0x131   :  { %v196_v9 = vpop.f32.mrf.mxu1 }
 0x132   :  { %v208_v10 = vpack.c.bf16 %v196_v9, %v194_v8  ;;  %v676_v8 = vld [vmem:[%s1072_s0 + $0x120] ss:$0 sm:$0xff] }
 0x134   :  { %648 = vmatmul.msk.bf16.vlgmr.msra.gmra.mxu2 %vm160_vm4, %v208_v10 }
 0x139   :  { %v199_v11 = vpop.f32.mrf.mxu1 }
 0x141   :  { %v201_v12 = vpop.f32.mrf.mxu1 }
 0x142   :  { %v209_v13 = vpack.c.bf16 %v201_v12, %v199_v11 }
 0x144   :  { %649 = vmatmul.msk.bf16.gmra.mxu2 %vm160_vm4, %v209_v13 }
 0x1a1   :  { %v233_v17 = vpop.f32.mrf.mxu0 }
 0x1a2   :  { %v234_v19 = vadd.f32 %v674_v18, %v233_v17 }
 0x1a4   :  { %683 = vtanh.f32 %v234_v19 }
 0x1a9   :  { %v235_v20 = vpop.f32.mrf.mxu0 }
 0x1aa   :  { %v236_v21 = vadd.f32 %v674_v18, %v235_v20  ;;  %v684_v22 = vpop.eup %683 }
 0x1ac   :  { %685 = vtanh.f32 %v236_v21 }
 0x1b2   :  { %v686_v23 = vpop.eup %685 }
 0x1b3   :  { %v258_v24 = vpack.c.bf16 %v686_v23, %v684_v22 }
 0x1b5   :  { %650 = vmatmul.msk.bf16.vlgmr.msra.gmra.mxu3 %vm9_vm1, %v258_v24 }
 0x1b7   :  { %v238_v25 = vpop.f32.mrf.mxu2 }
 0x1b8   :  { %v239_v26 = vadd.f32 %v674_v18, %v238_v25 }
 0x1ba   :  { %687 = vtanh.f32 %v239_v26 }
 0x1bf   :  { %v240_v27 = vpop.f32.mrf.mxu2 }
 0x1c0   :  { %v241_v28 = vadd.f32 %v674_v18, %v240_v27  ;;  %v688_v29 = vpop.eup %687 }
 0x1c2   :  { %689 = vtanh.f32 %v241_v28 }
 0x1c7   :  { %v243_v30 = vpop.f32.mrf.mxu2 }
 0x1c8   :  { %v690_v31 = vpop.eup %689  ;;  %v244_v33 = vadd.f32 %v674_v18, %v243_v30 }
 0x1c9   :  { %v259_v32 = vpack.c.bf16 %v690_v31, %v688_v29  ;;  %v381_v31 = vld [vmem:[%s1072_s0 + $0x128] sm:$0xff] }
 0x1ca   :  { %691 = vtanh.f32 %v244_v33 }
 0x1cb   :  { %651 = vmatmul.msk.bf16.gmra.mxu3 %vm9_vm1, %v259_v32  ;;  %v382_v32 = vpack.c.bf16 %v381_v31, %v381_v31 }
 0x1cd   :  { %v398_v33 = vsel %vm220_vm12, %v382_v32, 0 }
 0x1ce   :  { %407 = vmatpush.bf16.msra.mxu0 %v398_v33 }
 0x1cf   :  { %v245_v34 = vpop.f32.mrf.mxu2 }
 0x1d0   :  { %v246_v35 = vadd.f32 %v674_v18, %v245_v34  ;;  %v692_v36 = vpop.eup %691 }
 0x1d2   :  { %693 = vtanh.f32 %v246_v35 }
 0x1d8   :  { %v694_v37 = vpop.eup %693 }
 0x1d9   :  { %v260_v38 = vpack.c.bf16 %v694_v37, %v692_v36 }
 0x1db   :  { %652 = vmatmul.msk.bf16.gmra.mxu3 %vm9_vm1, %v260_v38 }
 0x238   :  { %v280_v43 = vpop.f32.mrf.mxu3 }
 0x239   :  { %v281_v45 = vadd.f32 %v675_v44, %v280_v43  ;;  %v432_v43 = vpack.c.bf16 %v431_v42, %v430_v40 }
 0x23b   :  { %695 = vtanh.f32 %v281_v45  ;;  %454 = vmatpush.bf16.msrb.mxu1 %v432_v43  ;;  %v677_v45 = vld [vmem:[%s1072_s0 + $0x130] ss:$0 sm:$0xff] }
 0x240   :  { %v282_v46 = vpop.f32.mrf.mxu3 }
 0x241   :  { %v283_v47 = vadd.f32 %v675_v44, %v282_v46  ;;  %v696_v48 = vpop.eup %695 }
 0x243   :  { %697 = vtanh.f32 %v283_v47 }
 0x249   :  { %v698_v49 = vpop.eup %697 }
 0x24a   :  { %v305_v50 = vpack.c.bf16 %v698_v49, %v696_v48 }
 0x24c   :  { %653 = vmatmul.msk.bf16.vlgmr.msrb.gmra.mxu2 %vm9_vm1, %v305_v50 }
 0x24e   :  { %v285_v51 = vpop.f32.mrf.mxu3 }
 0x24f   :  { %v286_v53 = vadd.f32 %v675_v44, %v285_v51 }
 0x251   :  { %699 = vtanh.f32 %v286_v53 }
 0x256   :  { %v287_v54 = vpop.f32.mrf.mxu3 }
 0x257   :  { %v288_v55 = vadd.f32 %v675_v44, %v287_v54  ;;  %v700_v56 = vpop.eup %699 }
 0x259   :  { %701 = vtanh.f32 %v288_v55 }
 0x25e   :  { %v290_v57 = vpop.f32.mrf.mxu3 }
 0x25f   :  { %v702_v58 = vpop.eup %701  ;;  %v291_v60 = vadd.f32 %v675_v44, %v290_v57 }
 0x260   :  { %v306_v59 = vpack.c.bf16 %v702_v58, %v700_v56 }
 0x261   :  { %703 = vtanh.f32 %v291_v60 }
 0x262   :  { %654 = vmatmul.msk.bf16.gmra.mxu2 %vm9_vm1, %v306_v59 }
 0x266   :  { %v292_v61 = vpop.f32.mrf.mxu3 }
 0x267   :  { %v293_v62 = vadd.f32 %v675_v44, %v292_v61  ;;  %v704_v63 = vpop.eup %703 }
 0x269   :  { %705 = vtanh.f32 %v293_v62 }
 0x26f   :  { %v706_v0 = vpop.eup %705 }
 0x270   :  { %v307_v2 = vpack.c.bf16 %v706_v0, %v704_v63 }
 0x272   :  { %655 = vmatmul.msk.bf16.gmra.mxu2 %vm9_vm1, %v307_v2 }
 0x2cf   :  { %v327_v3 = vpop.f32.mrf.mxu2 }
 0x2d0   :  { %v328_v15 = vadd.f32 %v676_v8, %v327_v3 }
 0x2d7   :  { %v329_v4 = vpop.f32.mrf.mxu2 }
 0x2d8   :  { %v330_v14 = vadd.f32 %v676_v8, %v329_v4  ;;  %v477_v4 = vld [vmem:[%s1072_s0 + $0x150] sm:$0xff] }
 0x2e5   :  { %v332_v5 = vpop.f32.mrf.mxu2 }
 0x2e6   :  { %v333_v12 = vadd.f32 %v676_v8, %v332_v5  ;;  %v478_v5 = vld [vmem:[%s1072_s0 + $0x158] sm:$0xff] }
 0x2ed   :  { %v334_v6 = vpop.f32.mrf.mxu2 }
 0x2ee   :  { %v335_v10 = vadd.f32 %v676_v8, %v334_v6  ;;  %v479_v6 = vpack.c.bf16 %v478_v5, %v477_v4  ;;  %v680_v4 = vld [vmem:[%s1072_s0 + $0x170] ss:$0 sm:$0xff] }
 0x2f0   :  { %501 = vmatpush.bf16.msra.mxu2 %v479_v6 }
 0x2f5   :  { %v337_v7 = vpop.f32.mrf.mxu2 }
 0x2f6   :  { %v338_v9 = vadd.f32 %v676_v8, %v337_v7 }
 0x2f8   :  { %707 = vtanh.f32 %v338_v9 }
 0x2f9   :  { %709 = vtanh.f32 %v335_v10 }
 0x2fd   :  { %v339_v11 = vpop.f32.mrf.mxu2 }
 0x2fe   :  { %v340_v13 = vadd.f32 %v676_v8, %v339_v11  ;;  %v708_v16 = vpop.eup %707  ;;  %v678_v8 = vld [vmem:[%s1072_s0 + $0x148] ss:$0 sm:$0xff] }
 0x2ff   :  { %v710_v17 = vpop.eup %709 }
 0x300   :  { %711 = vtanh.f32 %v340_v13 }
 0x301   :  { %713 = vtanh.f32 %v333_v12 }
 0x302   :  { %715 = vtanh.f32 %v330_v14 }
 0x303   :  { %717 = vtanh.f32 %v328_v15 }
 0x304   :  { %719 = vtanh.f32 %v708_v16 }
 0x306   :  { %v712_v18 = vpop.eup %711 }
 0x307   :  { %721 = vtanh.f32 %v712_v18  ;;  %v714_v19 = vpop.eup %713 }
 0x308   :  { %723 = vtanh.f32 %v710_v17  ;;  %v716_v20 = vpop.eup %715 }
 0x309   :  { %v718_v21 = vpop.eup %717  ;;  %725 = vtanh.f32 %v714_v19 }
 0x30a   :  { %v720_v22 = vpop.eup %719  ;;  %727 = vtanh.f32 %v716_v20 }
 0x30b   :  { %729 = vtanh.f32 %v718_v21 }
 0x30d   :  { %v722_v23 = vpop.eup %721 }
 0x30e   :  { %v356_v24 = vpack.c.bf16 %v722_v23, %v720_v22  ;;  %v724_v25 = vpop.eup %723 }
 0x30f   :  { %v726_v26 = vpop.eup %725 }
 0x310   :  { %362 = vmatpush.bf16.msrb.mxu3 %v356_v24  ;;  %v355_v27 = vpack.c.bf16 %v724_v25, %v726_v26  ;;  %v728_v28 = vpop.eup %727 }
 0x311   :  { %v730_v29 = vpop.eup %729 }
 0x312   :  { %v354_v30 = vpack.c.bf16 %v728_v28, %v730_v29 }
 0x314   :  { %363 = vmatpush.bf16.msrb.mxu3 %v355_v27 }
 0x318   :  { %364 = vmatpush.bf16.msrb.mxu3 %v354_v30 }
 0x31b   :  { %656 = vmatmul.msk.bf16.vlgmr.msrb.gmra.mxu3 %vm35_vm0, %v928_v41 }
 0x32b   :  { %657 = vmatmul.msk.bf16.gmra.mxu3 %vm35_vm0, %v943_v52 }
 0x33b   :  { %658 = vmatmul.msk.bf16.gmra.mxu3 %vm35_vm0, %v961_v1 }
 0x39e   :  { %v366_v34 = vpop.f32.mrf.mxu3 }
 0x3a6   :  { %v368_v35 = vpop.f32.mrf.mxu3 }
 0x3a7   :  { %v384_v36 = vpack.c.bf16 %v368_v35, %v366_v34  ;;  %v679_v34 = vld [vmem:[%s1072_s0 + $0x160] ss:$0 sm:$0xff] }
 0x3a9   :  { %659 = vmatmul.msk.bf16.vlgmr.msra.gmra.mxu0 %vm160_vm4, %v384_v36 }
 0x3ae   :  { %v371_v41 = vpop.f32.mrf.mxu3 }
 0x3b6   :  { %v373_v37 = vpop.f32.mrf.mxu3 }
 0x3b7   :  { %v385_v38 = vpack.c.bf16 %v373_v37, %v371_v41  ;;  %v551_v41 = vld [vmem:[%s1072_s0 + $0x168] sm:$0xff] }
 0x3b8   :  { %v552_v37 = vpack.c.bf16 %v551_v41, %v551_v41 }
 0x3b9   :  { %660 = vmatmul.msk.bf16.gmra.mxu0 %vm160_vm4, %v385_v38 }
 0x3be   :  { %v376_v52 = vpop.f32.mrf.mxu3 }
 0x3c6   :  { %v378_v1 = vpop.f32.mrf.mxu3 }
 0x3c7   :  { %v386_v39 = vpack.c.bf16 %v378_v1, %v376_v52 }
 0x3c9   :  { %661 = vmatmul.msk.bf16.gmra.mxu0 %vm160_vm4, %v386_v39  ;;  %v560_v39 = vsel %vm220_vm12, %v552_v37, 0 }
 0x3ca   :  { %569 = vmatpush.bf16.msrb.mxu0 %v560_v39 }
 0x426   :  { %v409_v44 = vpop.f32.mrf.mxu0 }
 0x427   :  { %v410_v46 = vadd.f32 %v677_v45, %v409_v44 }
 0x429   :  { %731 = vtanh.f32 %v410_v46 }
 0x42e   :  { %v411_v47 = vpop.f32.mrf.mxu0 }
 0x42f   :  { %v412_v48 = vadd.f32 %v677_v45, %v411_v47  ;;  %v732_v49 = vpop.eup %731 }
 0x431   :  { %733 = vtanh.f32 %v412_v48 }
 0x436   :  { %v414_v50 = vpop.f32.mrf.mxu0 }
 0x437   :  { %v734_v51 = vpop.eup %733  ;;  %v415_v54 = vadd.f32 %v677_v45, %v414_v50 }
 0x438   :  { %v434_v53 = vpack.c.bf16 %v734_v51, %v732_v49 }
 0x439   :  { %735 = vtanh.f32 %v415_v54 }
 0x43a   :  { %662 = vmatmul.msk.bf16.vlgmr.msrb.gmra.mxu1 %vm9_vm1, %v434_v53 }
 0x43e   :  { %v416_v55 = vpop.f32.mrf.mxu0 }
 0x43f   :  { %v417_v56 = vadd.f32 %v677_v45, %v416_v55  ;;  %v736_v57 = vpop.eup %735 }
 0x441   :  { %737 = vtanh.f32 %v417_v56 }
 0x446   :  { %v419_v58 = vpop.f32.mrf.mxu0 }
 0x447   :  { %v738_v59 = vpop.eup %737  ;;  %v420_v61 = vadd.f32 %v677_v45, %v419_v58 }
 0x448   :  { %v435_v60 = vpack.c.bf16 %v738_v59, %v736_v57  ;;  %v530_v57 = vld [vmem:[%s1072_s0 + $0xe0] sm:$0x3f] }
 0x449   :  { %739 = vtanh.f32 %v420_v61  ;;  %v576_v61 = vld [vmem:[%s1072_s0 + $0x178] sm:$0xff] }
 0x44a   :  { %663 = vmatmul.msk.bf16.gmra.mxu1 %vm9_vm1, %v435_v60  ;;  %v531_v60 = vpack.c.bf16 %v530_v57, %v530_v57 }
 0x44e   :  { %v421_v62 = vpop.f32.mrf.mxu0 }
 0x44f   :  { %v422_v63 = vadd.f32 %v677_v45, %v421_v62  ;;  %v740_v0 = vpop.eup %739  ;;  %v577_v62 = vld [vmem:[%s1072_s0 + $0x180] sm:$0xff] }
 0x451   :  { %741 = vtanh.f32 %v422_v63  ;;  %v578_v63 = vpack.c.bf16 %v577_v62, %v576_v61 }
 0x453   :  { %592 = vmatpush.bf16.msra.mxu1 %v578_v63 }
 0x457   :  { %v742_v2 = vpop.eup %741 }
 0x458   :  { %v436_v3 = vpack.c.bf16 %v742_v2, %v740_v0 }
 0x45a   :  { %664 = vmatmul.msk.bf16.gmra.mxu1 %vm9_vm1, %v436_v3 }
 0x4b7   :  { %v456_v7 = vpop.f32.mrf.mxu1 }
 0x4b8   :  { %v457_v9 = vadd.f32 %v678_v8, %v456_v7 }
 0x4ba   :  { %743 = vtanh.f32 %v457_v9 }
 0x4bf   :  { %v458_v10 = vpop.f32.mrf.mxu1 }
 0x4c0   :  { %v459_v11 = vadd.f32 %v678_v8, %v458_v10  ;;  %v744_v12 = vpop.eup %743  ;;  %v599_v10 = vld [vmem:[%s1072_s0 + $0x190] sm:$0xff] }
 0x4c2   :  { %745 = vtanh.f32 %v459_v11  ;;  %v600_v11 = vpack.c.bf16 %v599_v10, %v599_v10 }
 0x4c7   :  { %v461_v13 = vpop.f32.mrf.mxu1 }
 0x4c8   :  { %v746_v14 = vpop.eup %745  ;;  %v462_v16 = vadd.f32 %v678_v8, %v461_v13  ;;  %v681_v13 = vld [vmem:[%s1072_s0 + $0x188] ss:$0 sm:$0xff] }
 0x4c9   :  { %v481_v15 = vpack.c.bf16 %v746_v14, %v744_v12  ;;  %v608_v12 = vsel %vm220_vm12, %v600_v11, 0 }
 0x4ca   :  { %747 = vtanh.f32 %v462_v16 }
 0x4cb   :  { %665 = vmatmul.msk.bf16.vlgmr.msra.gmra.mxu2 %vm9_vm1, %v481_v15 }
 0x4cf   :  { %v463_v17 = vpop.f32.mrf.mxu1 }
 0x4d0   :  { %v464_v18 = vadd.f32 %v678_v8, %v463_v17  ;;  %v748_v19 = vpop.eup %747 }
 0x4d2   :  { %749 = vtanh.f32 %v464_v18 }
 0x4d7   :  { %v466_v20 = vpop.f32.mrf.mxu1 }
 0x4d8   :  { %v750_v21 = vpop.eup %749  ;;  %v467_v23 = vadd.f32 %v678_v8, %v466_v20 }
 0x4d9   :  { %v482_v22 = vpack.c.bf16 %v750_v21, %v748_v19  ;;  %v682_v19 = vld [vmem:[%s1072_s0 + $0x198] ss:$0 sm:$0xff] }
 0x4da   :  { %751 = vtanh.f32 %v467_v23 }
 0x4db   :  { %666 = vmatmul.msk.bf16.gmra.mxu2 %vm9_vm1, %v482_v22 }
 0x4df   :  { %v468_v24 = vpop.f32.mrf.mxu1 }
 0x4e0   :  { %v469_v25 = vadd.f32 %v678_v8, %v468_v24  ;;  %v752_v26 = vpop.eup %751 }
 0x4e2   :  { %753 = vtanh.f32 %v469_v25 }
 0x4e8   :  { %v754_v27 = vpop.eup %753 }
 0x4e9   :  { %v483_v28 = vpack.c.bf16 %v754_v27, %v752_v26 }
 0x4eb   :  { %667 = vmatmul.msk.bf16.gmra.mxu2 %vm9_vm1, %v483_v28 }
 0x54e   :  { %v503_v29 = vpop.f32.mrf.mxu2 }
 0x54f   :  { %v504_v42 = vadd.f32 %v679_v34, %v503_v29 }
 0x556   :  { %v505_v30 = vpop.f32.mrf.mxu2 }
 0x557   :  { %v506_v40 = vadd.f32 %v679_v34, %v505_v30 }
 0x55e   :  { %v508_v31 = vpop.f32.mrf.mxu2 }
 0x55f   :  { %v509_v52 = vadd.f32 %v679_v34, %v508_v31 }
 0x566   :  { %v510_v32 = vpop.f32.mrf.mxu2 }
 0x567   :  { %v511_v36 = vadd.f32 %v679_v34, %v510_v32 }
 0x56e   :  { %v513_v33 = vpop.f32.mrf.mxu2 }
 0x56f   :  { %v514_v35 = vadd.f32 %v679_v34, %v513_v33 }
 0x571   :  { %755 = vtanh.f32 %v514_v35 }
 0x572   :  { %757 = vtanh.f32 %v511_v36 }
 0x576   :  { %v515_v38 = vpop.f32.mrf.mxu2 }
 0x577   :  { %v516_v1 = vadd.f32 %v679_v34, %v515_v38  ;;  %v756_v43 = vpop.eup %755 }
 0x578   :  { %v758_v44 = vpop.eup %757 }
 0x579   :  { %759 = vtanh.f32 %v516_v1 }
 0x57a   :  { %761 = vtanh.f32 %v509_v52 }
 0x57b   :  { %763 = vtanh.f32 %v506_v40 }
 0x57c   :  { %765 = vtanh.f32 %v504_v42 }
 0x57d   :  { %767 = vtanh.f32 %v756_v43 }
 0x57f   :  { %v760_v45 = vpop.eup %759 }
 0x580   :  { %769 = vtanh.f32 %v760_v45  ;;  %v762_v46 = vpop.eup %761 }
 0x581   :  { %771 = vtanh.f32 %v758_v44  ;;  %v764_v47 = vpop.eup %763 }
 0x582   :  { %v766_v48 = vpop.eup %765  ;;  %773 = vtanh.f32 %v762_v46 }
 0x583   :  { %v768_v49 = vpop.eup %767  ;;  %775 = vtanh.f32 %v764_v47 }
 0x584   :  { %777 = vtanh.f32 %v766_v48 }
 0x586   :  { %v770_v50 = vpop.eup %769 }
 0x587   :  { %v534_v51 = vpack.c.bf16 %v770_v50, %v768_v49  ;;  %v772_v53 = vpop.eup %771 }
 0x588   :  { %v774_v54 = vpop.eup %773 }
 0x589   :  { %543 = vmatpush.bf16.msra.mxu3 %v534_v51  ;;  %v533_v55 = vpack.c.bf16 %v772_v53, %v774_v54  ;;  %v776_v56 = vpop.eup %775 }
 0x58a   :  { %v778_v58 = vpop.eup %777 }
 0x58b   :  { %v532_v59 = vpack.c.bf16 %v776_v56, %v778_v58 }
 0x58d   :  { %544 = vmatpush.bf16.msra.mxu3 %v533_v55 }
 0x591   :  { %545 = vmatpush.bf16.msra.mxu3 %v532_v59 }
 0x594   :  { %668 = vmatmul.msk.bf16.vlgmr.msra.gmra.mxu3 %vm35_vm0, %v531_v60 }
 0x595   :  { %617 = vmatpush.bf16.msrb.mxu3 %v608_v12 }
 0x617   :  { %v547_v0 = vpop.f32.mrf.mxu3 }
 0x618   :  { %v554_v2 = vpack.c.bf16 %v547_v0, %v547_v0 }
 0x61a   :  { %669 = vmatmul.msk.bf16.vlgmr.msrb.gmra.mxu0 %vm160_vm4, %v554_v2 }
 0x61f   :  { %v549_v3 = vpop.f32.mrf.mxu3 }
 0x697   :  { %v571_v5 = vpop.f32.mrf.mxu0 }
 0x698   :  { %v572_v6 = vadd.f32 %v680_v4, %v571_v5 }
 0x69a   :  { %779 = vtanh.f32 %v572_v6 }
 0x69f   :  { %v573_v7 = vpop.f32.mrf.mxu0 }
 0x6a0   :  { %v780_v8 = vpop.eup %779 }
 0x6a1   :  { %v580_v9 = vpack.c.bf16 %v780_v8, %v780_v8 }
 0x6a3   :  { %670 = vmatmul.msk.bf16.vlgmr.msra.gmra.mxu1 %vm9_vm1, %v580_v9 }
 0x720   :  { %v594_v14 = vpop.f32.mrf.mxu1 }
 0x721   :  { %v595_v15 = vadd.f32 %v681_v13, %v594_v14 }
 0x723   :  { %781 = vtanh.f32 %v595_v15 }
 0x728   :  { %v596_v16 = vpop.f32.mrf.mxu1 }
 0x729   :  { %v782_v17 = vpop.eup %781 }
 0x72a   :  { %v602_v18 = vpack.c.bf16 %v782_v17, %v782_v17 }
 0x72c   :  { %671 = vmatmul.msk.bf16.vlgmr.msrb.gmra.mxu3 %vm160_vm4, %v602_v18 }
 0x7af   :  { %v619_v20 = vpop.f32.mrf.mxu3 }
 0x7b0   :  { %v620_v21 = vadd.f32 %v682_v19, %v619_v20 }
 0x7b2   :  { %783 = vtanh.f32 %v620_v21 }
 0x7b7   :  { %v621_v22 = vpop.f32.mrf.mxu3 }
 0x7b8   :  { %v784_v23 = vpop.eup %783 }
 0x7b9   :  { %625 = vst.msk [vmem:[%s1073_s1 + $0x30] sm:$0x3f] %vm624_vm13, %v784_v23 }

</bundles_post_ra>
